<compile_context>
chip_gen: v7x
topology: tpu7x:2x2x1
jax: 0.10.0
libtpu: 0.0.40
codegen_flags: <defaults>
</compile_context>

<pallas_src>
import numpy as np
import jax
import jax.numpy as jnp
from jax import lax
from jax.experimental import pallas as pl
from jax.experimental.pallas import tpu as pltpu

BN_EPS = 1e-5


# ----------------------------------------------------------------------------
# One-time, cached pltpu.roll convention probe (kept for robustness).
# ----------------------------------------------------------------------------
_ROLL_IS_JNP = None


def _roll_is_jnp():
    """True if pltpu.roll(x, s, axis) == jnp.roll(x, s, axis)."""
    global _ROLL_IS_JNP
    if _ROLL_IS_JNP is None:
        def probe(x_ref, o_ref):
            o_ref[...] = pltpu.roll(x_ref[...], 1, axis=1)

        x = jnp.tile(jnp.arange(128, dtype=jnp.float32)[None, :], (8, 1))
        y = pl.pallas_call(
            probe, out_shape=jax.ShapeDtypeStruct((8, 128), jnp.float32))(x)
        # jnp.roll convention: out[i] = in[i - 1]  =>  out[0, 1] == 0.0
        _ROLL_IS_JNP = bool(np.asarray(y)[0, 1] == 0.0)
    return _ROLL_IS_JNP


def _guess_tensorcores_per_chip():
    """Best-effort TC-per-chip count (v7x: 2).  Defaults to 1 (v5e/v6e)."""
    try:
        info = pltpu.get_tpu_info()
        for name in ("num_cores", "core_count", "num_tensorcores",
                     "tensorcores_per_chip"):
            v = getattr(info, name, None)
            if isinstance(v, int) and v > 0:
                return v
    except Exception:
        pass
    return 1


def _default_num_blocks(N):
    nb = min(N, _guess_tensorcores_per_chip())
    nb = max(nb, 1)
    while N % nb:
        nb -= 1
    return nb


# ----------------------------------------------------------------------------
# Pallas kernel
# ----------------------------------------------------------------------------
def _make_kernel(Cin, K, L, shifts, roll_is_jnp):
    """shifts = (sH1, sW1, sH2, sW2): static lane shifts for the 4 tap-convs.
    L is the lane width of one block (images_per_block * H * W)."""
    sH1, sW1, sH2, sW2 = shifts

    def shift_right(a, s):      # out[:, p] = a[:, (p - s) % L]   (circular)
        return pltpu.roll(a, s if roll_is_jnp else L - s, axis=1)

    def shift_left(a, s):       # out[:, p] = a[:, (p + s) % L]   (circular)
        return pltpu.roll(a, L - s if roll_is_jnp else s, axis=1)

    def kernel(x_ref, w0_ref, b0_ref, wa_ref, ba_ref, wb_ref, bb_ref,
               wc_ref, bc_ref, wd_ref, bd_ref, m_ref, out_ref):
        x = x_ref[...]                                   # (Cin, L) f32

        def conv3(y, w_ref, b_ref, s, mrow):
            # Contraction-side tap stacking: shifted+masked (3K, L) bf16
            # activation, ONE (K, 3K) x (3K, L) MXU matmul (f32 accumulation).
            # Wrapped lanes (array wrap AND image-boundary bleed) are zeroed by
            # the per-image boundary masks.
            t0 = shift_right(y, s) * m_ref[mrow:mrow + 1, :]
            t2 = shift_left(y, s) * m_ref[mrow + 1:mrow + 2, :]
            a = jnp.concatenate([t0, y, t2], axis=0).astype(jnp.bfloat16)
            return jnp.dot(w_ref[...], a,
                           preferred_element_type=jnp.float32) + b_ref[...]

        # conv1x1 + BN0 (folded) + ReLU — single bf16 MXU pass
        y = jnp.dot(w0_ref[...], x.astype(jnp.bfloat16),
                    preferred_element_type=jnp.float32)
        y = jnp.maximum(y + b0_ref[...], 0.0)
        # conv3x1_1 (H), conv1x3_1 (W) + BN1 (folded) + ReLU
        y = conv3(y, wa_ref, ba_ref, sH1, 0)
        y = conv3(y, wb_ref, bb_ref, sW1, 2)
        y = jnp.maximum(y, 0.0)
        # dilated conv3x1_2 (H), conv1x3_2 (W) + BN2 (folded) + ReLU
        y = conv3(y, wc_ref, bc_ref, sH2, 4)
        y = conv3(y, wd_ref, bd_ref, sW2, 6)
        y = jnp.maximum(y, 0.0)
        # Dropout2d(p=0.02) is identity in eval mode.
        # Fused residual concat: [conv_out, input] along channels.
        out_ref[0:K, :] = y
        out_ref[K:K + Cin, :] = x

    return kernel


def _build_masks(H, W, dilated, imgs_per_block):
    """(8, imgs_per_block*H*W) f32 0/1 boundary masks, tiled per image."""
    HW = H * W
    p = np.arange(HW)
    w = p % W
    rows = []
    for d in (1, dilated):
        rows.append(p >= d * W)        # H-conv, "top" tap (reads h-d) valid
        rows.append(p < HW - d * W)    # H-conv, "bottom" tap (reads h+d) valid
        rows.append(w >= d)            # W-conv, "left" tap (reads w-d) valid
        rows.append(w < W - d)         # W-conv, "right" tap (reads w+d) valid
    m = np.stack(rows).astype(np.float32)               # (8, HW)
    return jnp.asarray(np.tile(m, (1, imgs_per_block)))  # (8, ipb*HW)


def eda_forward(x_nchw, fused, dilated, n_blocks=None):
    """x_nchw: (N, Cin, H, W) float32 -> (N, K + Cin, H, W) float32."""
    N, Cin, H, W = x_nchw.shape
    K = fused["b0"].shape[0]
    HW = H * W
    if n_blocks is None:
        n_blocks = _default_num_blocks(N)
    assert N % n_blocks == 0
    ipb = N // n_blocks                 # images per grid block
    L = ipb * HW                        # lane width per block
    roll_is_jnp = _roll_is_jnp()

    # Channel-major (C, N*H*W): channels on sublanes, batch folded into lanes.
    # The transpose/reshape is wrapper-side layout plumbing (tiny at this size).
    x_cm = jnp.transpose(x_nchw, (1, 0, 2, 3)).reshape(Cin, N * HW)
    masks = _build_masks(H, W, dilated, ipb)
    shifts = (W, 1, dilated * W, dilated)

    def const_spec(arr):
        nd = arr.ndim
        return pl.BlockSpec(arr.shape, lambda b, _n=nd: (0,) * _n)

    weights = [fused[k] for k in
               ("w0", "b0", "wa", "ba", "wb", "bb", "wc", "bc", "wd", "bd")]
    in_specs = ([pl.BlockSpec((Cin, L), lambda b: (0, b))]
                + [const_spec(a) for a in weights]
                + [const_spec(masks)])
    out_specs = pl.BlockSpec((K + Cin, L), lambda b: (0, b))

    y_cm = pl.pallas_call(
        _make_kernel(Cin, K, L, shifts, roll_is_jnp),
        out_shape=jax.ShapeDtypeStruct((K + Cin, N * HW), jnp.float32),
        grid=(n_blocks,),
        in_specs=in_specs,
        out_specs=out_specs,
        compiler_params=pltpu.CompilerParams(
            dimension_semantics=("parallel",)),
    )(x_cm, *weights, masks)

    return jnp.transpose(y_cm.reshape(K + Cin, N, H, W), (1, 0, 2, 3))


# ----------------------------------------------------------------------------
# Deterministic parameter initialization (PyTorch-like) + BN folding.
# Tap weights are stacked CONTRACTION-side as (K, 3K) bf16: column block
# [r*K:(r+1)*K] = tap r (c_out rows, c_in columns).
# ----------------------------------------------------------------------------
def init_params(key, ninput, k):
    keys = jax.random.split(key, 22)
    it = iter(keys)

    def conv_init(out_c, in_c, kh, kw):
        fan_in = in_c * kh * kw
        bound = 1.0 / np.sqrt(fan_in)
        w = jax.random.uniform(next(it), (out_c, in_c, kh, kw), jnp.float32,
                               -bound, bound)
        b = jax.random.uniform(next(it), (out_c,), jnp.float32, -bound, bound)
        return w, b

    def bn_init(c):
        gamma = jax.random.uniform(next(it), (c,), jnp.float32, 0.5, 1.5)
        beta = 0.1 * jax.random.normal(next(it), (c,), jnp.float32)
        mean = 0.1 * jax.random.normal(next(it), (c,), jnp.float32)
        var = jax.random.uniform(next(it), (c,), jnp.float32, 0.5, 1.5)
        return gamma, beta, mean, var

    raw = {}
    raw["c1_w"], raw["c1_b"] = conv_init(k, ninput, 1, 1)
    raw["bn0"] = bn_init(k)
    raw["c31a_w"], raw["c31a_b"] = conv_init(k, k, 3, 1)
    raw["c13a_w"], raw["c13a_b"] = conv_init(k, k, 1, 3)
    raw["bn1"] = bn_init(k)
    raw["c31b_w"], raw["c31b_b"] = conv_init(k, k, 3, 1)
    raw["c13b_w"], raw["c13b_b"] = conv_init(k, k, 1, 3)
    raw["bn2"] = bn_init(k)

    def fold(bn):
        g, beta, m, v = bn
        return g / jnp.sqrt(v + BN_EPS), beta, m

    def stack_taps(w4d, axis, scale=None):
        taps = [w4d[:, :, r, 0] if axis == "h" else w4d[:, :, 0, r]
                for r in range(3)]
        if scale is not None:
            taps = [t * scale[:, None] for t in taps]
        return jnp.concatenate(taps, axis=1).astype(jnp.bfloat16)   # (K, 3K)

    # conv1x1 + BN0 folded (bf16 weight -> single MXU pass; Cin contraction tiny)
    s0, beta0, m0 = fold(raw["bn0"])
    w0 = (raw["c1_w"][:, :, 0, 0] * s0[:, None]).astype(jnp.bfloat16)  # (K, Cin)
    b0 = ((raw["c1_b"] - m0) * s0 + beta0)[:, None]                    # (K, 1)

    # conv3x1_1 (plain bias)
    wa = stack_taps(raw["c31a_w"], "h")
    ba = raw["c31a_b"][:, None]
    # conv1x3_1 + BN1 folded
    s1, beta1, m1 = fold(raw["bn1"])
    wb = stack_taps(raw["c13a_w"], "w", s1)
    bb = ((raw["c13a_b"] - m1) * s1 + beta1)[:, None]
    # dilated conv3x1_2 (plain bias)
    wc = stack_taps(raw["c31b_w"], "h")
    bc = raw["c31b_b"][:, None]
    # dilated conv1x3_2 + BN2 folded
    s2, beta2, m2 = fold(raw["bn2"])
    wd = stack_taps(raw["c13b_w"], "w", s2)
    bd = ((raw["c13b_b"] - m2) * s2 + beta2)[:, None]

    fused = dict(w0=w0, b0=b0, wa=wa, ba=ba, wb=wb, bb=bb,
                 wc=wc, bc=bc, wd=wd, bd=bd)
    return raw, fused


# ----------------------------------------------------------------------------
# Pure-JAX reference (mirrors the PyTorch forward in eval mode, f32 HIGHEST)
# ----------------------------------------------------------------------------
def ref_forward(x, rp, dilated):
    def conv(x, w, b, pad, dil):
        y = lax.conv_general_dilated(
            x, w, window_strides=(1, 1), padding=pad, rhs_dilation=dil,
            dimension_numbers=("NCHW", "OIHW", "NCHW"),
            precision=lax.Precision.HIGHEST)
        return y + b[None, :, None, None]

    def bn(x, p):
        g, beta, m, v = p
        return (g[None, :, None, None] * (x - m[None, :, None, None])
                / jnp.sqrt(v[None, :, None, None] + BN_EPS)
                + beta[None, :, None, None])

    out = conv(x, rp["c1_w"], rp["c1_b"], ((0, 0), (0, 0)), (1, 1))
    out = jax.nn.relu(bn(out, rp["bn0"]))
    out = conv(out, rp["c31a_w"], rp["c31a_b"], ((1, 1), (0, 0)), (1, 1))
    out = conv(out, rp["c13a_w"], rp["c13a_b"], ((0, 0), (1, 1)), (1, 1))
    out = jax.nn.relu(bn(out, rp["bn1"]))
    out = conv(out, rp["c31b_w"], rp["c31b_b"],
               ((dilated, dilated), (0, 0)), (dilated, 1))
    out = conv(out, rp["c13b_w"], rp["c13b_b"],
               ((0, 0), (dilated, dilated)), (1, dilated))
    out = jax.nn.relu(bn(out, rp["bn2"]))
    return jnp.concatenate([out, x], axis=1)


# ----------------------------------------------------------------------------
if __name__ == "__main__":
    N, Cin, H, W = 2, 4, 16, 16
    K, dilated = 40, 2

    key = jax.random.PRNGKey(0)
    kx, kp = jax.random.split(key)
    x = jax.random.normal(kx, (N, Cin, H, W), jnp.float32)
    raw, fused = init_params(kp, Cin, K)

    out = jax.block_until_ready(eda_forward(x, fused, dilated))
    assert out.shape == (N, K + Cin, H, W)

    ref = jax.block_until_ready(ref_forward(x, raw, dilated))
    # Tolerance accounts for bf16 MXU operands (f32 accumulation) vs the
    # f32 Precision.HIGHEST reference; still catches tap/BN/layout bugs.
    np.testing.assert_allclose(np.asarray(out), np.asarray(ref),
                               rtol=5e-2, atol=5e-2)
    print("KERNEL_OK")
</pallas_src>

<mosaic_0001>
module attributes {stable_mosaic.version = 11 : i64} {
  func.func @probe(%arg0: memref<8x128xf32, #tpu.memory_space<vmem>>, %arg1: memref<8x128xf32, #tpu.memory_space<vmem>>) attributes {dimension_semantics = [], scalar_prefetch = 0 : i64, scratch_operands = 0 : i64, tpu.core_type = #tpu.core_type<tc>} {
    %c0 = arith.constant 0 : index
    %c0_0 = arith.constant 0 : index
    %0 = vector.load %arg0[%c0, %c0_0] : memref<8x128xf32, #tpu.memory_space<vmem>>, vector<8x128xf32>
    %c1_i32 = arith.constant 1 : i32
    %1 = tpu.dynamic_rotate %0 by %c1_i32 dim 1 : vector<8x128xf32>, i32 -> vector<8x128xf32>
    %c0_1 = arith.constant 0 : index
    %c0_2 = arith.constant 0 : index
    %2 = vector.load %arg1[%c0_1, %c0_2] : memref<8x128xf32, #tpu.memory_space<vmem>>, vector<8x128xf32>
    tpu.vector_store %arg1[%c0_1, %c0_2], %1 {strides = array<i32>} : memref<8x128xf32, #tpu.memory_space<vmem>>, vector<8x128xf32>,
    return
  }
}

</mosaic_0001>

<bundles_post_ra>
// kernel: tpu_custom_call.1
= control target key start
LH: loop header
LB: loop body
LE: loop exit
PB: predicated region body
PF: predicated region fallthrough
CT: control target
= control target key end

     0   :  { %6 = vsyncpa [#allocation3], 0  ;;  %s128_s0 = inlined_call_operand.hbm [shape: f32[8,128], index: 0, kind: input, shape index: {}]   ;;  %s129_s1 = inlined_call_operand.hbm [shape: f32[8,128], index: 1, kind: output, shape index: {}]  }
   0x1   :  { %7 = vsyncpa [#allocation4], 0  ;;  %s91_s6 = smov [#allocation2]   ;;  %s43_s10 = scalar_lea.hbm %s128_s0, 128 }
   0x2   :  { %s14_s7 = sshll.u32 %s91_s6, 4  ;;  %p44_p0 = scmp.ne.s32.totalorder %s128_s0, %s43_s10  ;;  %s15_s7 = int_to_ptr.vmem [resolvable:$true] %s14_s7 }
   0x3   :  { %p47_p1 = scmp.lt.u32.totalorder %s43_s10, %s128_s0 }
   0x5   :  { %p49_p2 = pnand %p47_p1, %p44_p0 }
   0x7   :  { %52 = shalt.err (!%p49_p2)
}
   0x8   :  { %s53_s15 = scalar_lea.vmem %s15_s7, 128  ;;  %p58_p4 = scmp.lt.s32.totalorder %s15_s7, %s15_s7 }
   0x9   :  { %p54_p3 = scmp.ne.s32.totalorder %s15_s7, %s53_s15  ;;  %p59_p5 = scmp.lt.s32.totalorder %s53_s15, %s53_s15 }
   0xb   :  { %p60_p6 = por %p59_p5, %p58_p4 }
   0xd   :  { %p61_p7 = pnand %p60_p6, %p54_p3 }
   0xf   :  { %64 = shalt.err (!%p61_p7)
}
  0x10   :  { %17 = dma.hbm_to_vmem [thread:$0]  %s128_s0, 128, %s15_s7, [#allocation3]  }
  0x11   :  { %87 = dma.done.wait [#allocation3], 128  }
  0x12   :  { %88 = vsyncadd [#allocation3], 4294967168  ;;  %v21_v0 = vld [vmem:[#allocation2] sm:$0xff]  ;;  %s92_s18 = smov 1   ;;  %s93_s19 = smov [#allocation5]  }
  0x13   :  { %22 = vrot.lane.b32.xlu0 %v21_v0, %s92_s18  ;;  %s31_s20 = sshll.u32 %s93_s19, 4  ;;  %s32_s20 = int_to_ptr.vmem [resolvable:$true] %s31_s20 }
  0x14   :  { %s65_s21 = scalar_lea.vmem %s32_s20, 128  ;;  %p70_p9 = scmp.lt.s32.totalorder %s32_s20, %s32_s20 }
  0x15   :  { %p66_p8 = scmp.ne.s32.totalorder %s32_s20, %s65_s21  ;;  %p71_p10 = scmp.lt.s32.totalorder %s65_s21, %s65_s21 }
  0x17   :  { %p72_p11 = por %p71_p10, %p70_p9 }
  0x19   :  { %p73_p12 = pnand %p72_p11, %p66_p8 }
  0x85   :  { %v23_v1 = vpop.permute.xlu0 %22 }
  0x86   :  { %24 = vst [vmem:[#allocation5] sm:$0xff] %v23_v1 }
  0x87   :  { %76 = shalt.err (!%p73_p12)
}
  0x88   :  { %s77_s0 = scalar_lea.hbm %s129_s1, 128 }
  0x89   :  { %p78_p13 = scmp.ne.s32.totalorder %s129_s1, %s77_s0  ;;  %p81_p0 = scmp.lt.u32.totalorder %s77_s0, %s129_s1 }
  0x8b   :  { %p83_p1 = pnand %p81_p0, %p78_p13 }
  0x8d   :  { %86 = shalt.err (!%p83_p1)
}
  0x8e   :  { %34 = dma.vmem_to_hbm [thread:$0]  %s32_s20, 128, %s129_s1, [#allocation4]  }
  0x8f   :  { %89 = dma.done.wait [#allocation4], 128  }
  0x90   :  { %90 = vsyncadd [#allocation4], 4294967168 }
  0x91   :  { %38 = vsyncpa [#allocation3], 1 }
  0x92   :  { %39 = vsyncpa [#allocation4], 1 }

</bundles_post_ra>
